<compile_context>
chip_gen: v7x
topology: tpu7x:2x2x1
jax: 0.10.0
libtpu: 0.0.40
codegen_flags: <defaults>
</compile_context>

<pallas_src>
import functools

import jax
import jax.numpy as jnp
from jax import lax
from jax.experimental import pallas as pl
from jax.experimental.pallas import tpu as pltpu

N_EMBD = 64


def _mha_kernel(x_ref, wq_ref, wk_ref, wv_ref, wp_ref, bp_ref, o_ref, *,
                num_heads, head_size):
    B, T, C = x_ref.shape
    H, hs = num_heads, head_size
    D = H * hs  # == C for this module (asserted in the wrapper)

    x2d = x_ref[...].astype(jnp.float32).reshape(B * T, C)

    # Three lane-aligned projections (each result starts at lane 0).
    # PyTorch module scales scores by C**-0.5 (C=64 -> 0.125, exact): fold into q.
    q2d = jnp.dot(x2d, wq_ref[...], preferred_element_type=jnp.float32)
    q2d = q2d * jnp.float32(C ** -0.5)
    k2d = jnp.dot(x2d, wk_ref[...], preferred_element_type=jnp.float32)
    v2d = jnp.dot(x2d, wv_ref[...], preferred_element_type=jnp.float32)

    # (B*T, H*hs) -> (B*H, T, hs): one-time relayout (XLU slot) so the
    # attention matmuls run as single batched dot_generals over all heads.
    def to_heads(a):
        return jnp.swapaxes(a.reshape(B, T, H, hs), 1, 2).reshape(B * H, T, hs)

    q = to_heads(q2d)
    k = to_heads(k2d)
    v = to_heads(v2d)

    # All-head scores in one batched matmul (k never explicitly transposed).
    s = jnp.einsum('bqd,bkd->bqk', q, k,
                   preferred_element_type=jnp.float32)          # (B*H, T, T)
    s = s - jnp.max(s, axis=-1, keepdims=True)
    p = jnp.exp(s)
    denom = jnp.sum(p, axis=-1, keepdims=True)                  # (B*H, T, 1)
    # TODO(synk): attention dropout is identity (eval mode), not applied.

    # All-head P @ V in one batched matmul.
    o_h = jnp.einsum('bqk,bkd->bqd', p, v,
                     preferred_element_type=jnp.float32)        # (B*H, T, hs)
    # Normalize on the narrow hs-lane head output instead of the (T, T) scores.
    # (pl.reciprocal(..., approx=True) would be a further EUP-slot win but
    #  breaks the 1e-5 accuracy budget of the test below.)
    o_h = o_h * pl.reciprocal(denom)

    # (B*H, T, hs) -> (B*T, D) head-concat slab, then ONE fused output
    # projection with full K=D contraction depth.
    o_cat = jnp.swapaxes(o_h.reshape(B, H, T, hs), 1, 2).reshape(B * T, D)
    out = jnp.dot(o_cat, wp_ref[...], preferred_element_type=jnp.float32)
    out = out + bp_ref[...]
    # TODO(synk): output dropout is identity (eval mode), not applied.
    o_ref[...] = out.reshape(B, T, C).astype(o_ref.dtype)


def pack_head_weights(w):
    """One-time parameter prep: (H, C, hs) per-head weights -> (C, H*hs).

    Column block h*hs:(h+1)*hs of the result equals w[h], so x2d @ packed gives
    every head's projection in its contiguous lane slice. Do this at parameter
    load time, NOT per forward call.
    """
    H, C, hs = w.shape
    return jnp.transpose(w, (1, 0, 2)).reshape(C, H * hs)


def multi_head_attention(x, wq_pack, wk_pack, wv_pack, wp_t, bp, *,
                         num_heads, head_size):
    """x: (B, T, C); w{q,k,v}_pack: (C, H*hs); wp_t: (H*hs, C); bp: (1, C)."""
    B, T, C = x.shape
    D = num_heads * head_size
    assert D == C, "output projection slab assumes num_heads*head_size == n_embd"

    kernel = functools.partial(_mha_kernel, num_heads=num_heads,
                               head_size=head_size)
    vmem = pltpu.MemorySpace.VMEM
    return pl.pallas_call(
        kernel,
        out_shape=jax.ShapeDtypeStruct((B, T, C), x.dtype),
        # grid=() : single invocation; everything (~72 KB) resident in VMEM,
        # weights loaded exactly once (no per-step double-buffering). See the
        # TODO at the top for the v7x / large-B gridded variant.
        in_specs=[
            pl.BlockSpec(memory_space=vmem),  # x
            pl.BlockSpec(memory_space=vmem),  # packed q weight (C, D)
            pl.BlockSpec(memory_space=vmem),  # packed k weight (C, D)
            pl.BlockSpec(memory_space=vmem),  # packed v weight (C, D)
            pl.BlockSpec(memory_space=vmem),  # proj weight^T   (D, C)
            pl.BlockSpec(memory_space=vmem),  # proj bias       (1, C)
        ],
        out_specs=pl.BlockSpec(memory_space=vmem),
    )(x, wq_pack, wk_pack, wv_pack, wp_t, bp)


def reference_mha(x, wq, wk, wv, wp_t, bp, *, num_heads, head_size):
    C = x.shape[-1]
    outs = []
    for h in range(num_heads):
        q = x @ wq[h]
        k = x @ wk[h]
        v = x @ wv[h]
        wei = jax.nn.softmax((q @ jnp.swapaxes(k, -1, -2)) * (C ** -0.5), axis=-1)
        outs.append(wei @ v)
    cat = jnp.concatenate(outs, axis=-1)
    return cat @ wp_t + bp


if __name__ == "__main__":
    num_heads = 4
    head_size = 16  # num_heads * head_size == n_embd == 64
    B, T, C = 2, 8, N_EMBD

    key = jax.random.PRNGKey(0)
    kx, kq, kk, kv, kp, kb = jax.random.split(key, 6)

    # Deterministic synthetic parameters (Linear weights stored pre-transposed
    # so the kernel does x @ W directly, matching PyTorch's y = x @ W^T).
    x = jax.random.normal(kx, (B, T, C), dtype=jnp.float32)
    wq = jax.random.normal(kq, (num_heads, C, head_size), dtype=jnp.float32) * 0.1
    wk = jax.random.normal(kk, (num_heads, C, head_size), dtype=jnp.float32) * 0.1
    wv = jax.random.normal(kv, (num_heads, C, head_size), dtype=jnp.float32) * 0.1
    wp_t = jax.random.normal(kp, (C, C), dtype=jnp.float32) * 0.1  # proj.weight^T
    bp = jax.random.normal(kb, (1, C), dtype=jnp.float32) * 0.1    # proj.bias

    # One-time parameter prep (hoisted out of the per-call forward path).
    wq_pack = pack_head_weights(wq)
    wk_pack = pack_head_weights(wk)
    wv_pack = pack_head_weights(wv)

    out = multi_head_attention(x, wq_pack, wk_pack, wv_pack, wp_t, bp,
                               num_heads=num_heads, head_size=head_size)
    out = jax.block_until_ready(out)

    ref = reference_mha(x, wq, wk, wv, wp_t, bp,
                        num_heads=num_heads, head_size=head_size)
    assert out.shape == (B, T, C)
    assert jnp.allclose(out, ref, atol=1e-5, rtol=1e-5), "mismatch vs JAX reference"

    print("KERNEL_OK")
</pallas_src>

<mosaic_0001>
module attributes {stable_mosaic.version = 11 : i64} {
  func.func @_mha_kernel(%arg0: memref<2x8x64xf32, #tpu.memory_space<vmem>>, %arg1: memref<64x64xf32, #tpu.memory_space<vmem>>, %arg2: memref<64x64xf32, #tpu.memory_space<vmem>>, %arg3: memref<64x64xf32, #tpu.memory_space<vmem>>, %arg4: memref<64x64xf32, #tpu.memory_space<vmem>>, %arg5: memref<1x64xf32, #tpu.memory_space<vmem>>, %arg6: memref<2x8x64xf32, #tpu.memory_space<vmem>>) attributes {dimension_semantics = [], scalar_prefetch = 0 : i64, scratch_operands = 0 : i64, tpu.core_type = #tpu.core_type<tc>} {
    %c0 = arith.constant 0 : index
    %c0_0 = arith.constant 0 : index
    %c0_1 = arith.constant 0 : index
    %0 = vector.load %arg0[%c0, %c0_0, %c0_1] : memref<2x8x64xf32, #tpu.memory_space<vmem>>, vector<2x8x64xf32>
    %1 = vector.shape_cast %0 : vector<2x8x64xf32> to vector<16x64xf32>
    %c0_2 = arith.constant 0 : index
    %c0_3 = arith.constant 0 : index
    %2 = vector.load %arg1[%c0_2, %c0_3] : memref<64x64xf32, #tpu.memory_space<vmem>>, vector<64x64xf32>
    %cst = arith.constant dense<0.000000e+00> : vector<16x64xf32>
    %3 = tpu.matmul %1, %2, %cst {dimension_numbers = #tpu.dot_dimension_numbers<[1], [0], [0], [1], [0, 0, 1, 1], [], []>} : vector<16x64xf32>, vector<64x64xf32>, vector<16x64xf32> -> vector<16x64xf32>
    %cst_4 = arith.constant 1.250000e-01 : f32
    %4 = vector.broadcast %cst_4 : f32 to vector<16x64xf32>
    %5 = arith.mulf %3, %4 : vector<16x64xf32>
    %c0_5 = arith.constant 0 : index
    %c0_6 = arith.constant 0 : index
    %6 = vector.load %arg2[%c0_5, %c0_6] : memref<64x64xf32, #tpu.memory_space<vmem>>, vector<64x64xf32>
    %cst_7 = arith.constant dense<0.000000e+00> : vector<16x64xf32>
    %7 = tpu.matmul %1, %6, %cst_7 {dimension_numbers = #tpu.dot_dimension_numbers<[1], [0], [0], [1], [0, 0, 1, 1], [], []>} : vector<16x64xf32>, vector<64x64xf32>, vector<16x64xf32> -> vector<16x64xf32>
    %c0_8 = arith.constant 0 : index
    %c0_9 = arith.constant 0 : index
    %8 = vector.load %arg3[%c0_8, %c0_9] : memref<64x64xf32, #tpu.memory_space<vmem>>, vector<64x64xf32>
    %cst_10 = arith.constant dense<0.000000e+00> : vector<16x64xf32>
    %9 = tpu.matmul %1, %8, %cst_10 {dimension_numbers = #tpu.dot_dimension_numbers<[1], [0], [0], [1], [0, 0, 1, 1], [], []>} : vector<16x64xf32>, vector<64x64xf32>, vector<16x64xf32> -> vector<16x64xf32>
    %10 = vector.shape_cast %5 : vector<16x64xf32> to vector<2x8x4x16xf32>
    %11 = tpu.transpose %10, [0, 2, 1, 3] : vector<2x8x4x16xf32> -> vector<2x4x8x16xf32>
    %12 = vector.shape_cast %11 : vector<2x4x8x16xf32> to vector<8x8x16xf32>
    %13 = vector.shape_cast %7 : vector<16x64xf32> to vector<2x8x4x16xf32>
    %14 = tpu.transpose %13, [0, 2, 1, 3] : vector<2x8x4x16xf32> -> vector<2x4x8x16xf32>
    %15 = vector.shape_cast %14 : vector<2x4x8x16xf32> to vector<8x8x16xf32>
    %16 = vector.shape_cast %9 : vector<16x64xf32> to vector<2x8x4x16xf32>
    %17 = tpu.transpose %16, [0, 2, 1, 3] : vector<2x8x4x16xf32> -> vector<2x4x8x16xf32>
    %18 = vector.shape_cast %17 : vector<2x4x8x16xf32> to vector<8x8x16xf32>
    "tpu.trace_start"() <{level = 10 : i32, message = "bqd,bkd->bqk"}> : () -> ()
    %cst_11 = arith.constant dense<0.000000e+00> : vector<8x8x8xf32>
    %19 = tpu.matmul %12, %15, %cst_11 {dimension_numbers = #tpu.dot_dimension_numbers<[2], [2], [1], [1], [0, 0, 0, 1, 1, 1], [0], [0]>} : vector<8x8x16xf32>, vector<8x8x16xf32>, vector<8x8x8xf32> -> vector<8x8x8xf32>
    "tpu.trace_stop"() : () -> ()
    %cst_12 = arith.constant dense<0xFF800000> : vector<8x8xf32>
    %20 = vector.multi_reduction <maximumf>, %19, %cst_12 [2] : vector<8x8x8xf32> to vector<8x8xf32>
    %21 = vector.shape_cast %20 : vector<8x8xf32> to vector<8x8x1xf32>
    %22 = vector.broadcast %21 : vector<8x8x1xf32> to vector<8x8x8xf32>
    %23 = arith.subf %19, %22 : vector<8x8x8xf32>
    %24 = math.exp %23 : vector<8x8x8xf32>
    %cst_13 = arith.constant dense<0.000000e+00> : vector<8x8xf32>
    %25 = vector.multi_reduction <add>, %24, %cst_13 [2] : vector<8x8x8xf32> to vector<8x8xf32>
    %26 = vector.shape_cast %25 : vector<8x8xf32> to vector<8x8x1xf32>
    "tpu.trace_start"() <{level = 10 : i32, message = "bqk,bkd->bqd"}> : () -> ()
    %cst_14 = arith.constant dense<0.000000e+00> : vector<8x8x16xf32>
    %27 = tpu.matmul %24, %18, %cst_14 {dimension_numbers = #tpu.dot_dimension_numbers<[2], [1], [1], [2], [0, 0, 0, 1, 1, 2], [0], [0]>} : vector<8x8x8xf32>, vector<8x8x16xf32>, vector<8x8x16xf32> -> vector<8x8x16xf32>
    "tpu.trace_stop"() : () -> ()
    %28 = tpu.reciprocal %26 : vector<8x8x1xf32> -> vector<8x8x1xf32>
    %29 = vector.broadcast %28 : vector<8x8x1xf32> to vector<8x8x16xf32>
    %30 = arith.mulf %27, %29 : vector<8x8x16xf32>
    %31 = vector.shape_cast %30 : vector<8x8x16xf32> to vector<2x4x8x16xf32>
    %32 = tpu.transpose %31, [0, 2, 1, 3] : vector<2x4x8x16xf32> -> vector<2x8x4x16xf32>
    %33 = vector.shape_cast %32 : vector<2x8x4x16xf32> to vector<16x64xf32>
    %c0_15 = arith.constant 0 : index
    %c0_16 = arith.constant 0 : index
    %34 = vector.load %arg4[%c0_15, %c0_16] : memref<64x64xf32, #tpu.memory_space<vmem>>, vector<64x64xf32>
    %cst_17 = arith.constant dense<0.000000e+00> : vector<16x64xf32>
    %35 = tpu.matmul %33, %34, %cst_17 {dimension_numbers = #tpu.dot_dimension_numbers<[1], [0], [0], [1], [0, 0, 1, 1], [], []>} : vector<16x64xf32>, vector<64x64xf32>, vector<16x64xf32> -> vector<16x64xf32>
    %c0_18 = arith.constant 0 : index
    %c0_19 = arith.constant 0 : index
    %36 = vector.load %arg5[%c0_18, %c0_19] : memref<1x64xf32, #tpu.memory_space<vmem>>, vector<1x64xf32>
    %37 = vector.broadcast %36 : vector<1x64xf32> to vector<16x64xf32>
    %38 = arith.addf %35, %37 : vector<16x64xf32>
    %39 = vector.shape_cast %38 : vector<16x64xf32> to vector<2x8x64xf32>
    %c0_20 = arith.constant 0 : index
    %c0_21 = arith.constant 0 : index
    %c0_22 = arith.constant 0 : index
    %40 = vector.load %arg6[%c0_20, %c0_21, %c0_22] : memref<2x8x64xf32, #tpu.memory_space<vmem>>, vector<2x8x64xf32>
    tpu.vector_store %arg6[%c0_20, %c0_21, %c0_22], %39 {strides = array<i32>} : memref<2x8x64xf32, #tpu.memory_space<vmem>>, vector<2x8x64xf32>,
    return
  }
}

</mosaic_0001>

<bundles_post_ra>
// kernel: tpu_custom_call.1
= control target key start
LH: loop header
LB: loop body
LE: loop exit
PB: predicated region body
PF: predicated region fallthrough
CT: control target
= control target key end

     0   :  { %11 = vsyncpa [#allocation3], 0  ;;  %s3973_s0 = inlined_call_operand.hbm [shape: f32[2,8,64], index: 0, kind: input, shape index: {}]   ;;  %s3974_s1 = inlined_call_operand.hbm [shape: f32[64,64], index: 1, kind: input, shape index: {}]   ;;  %s3975_s2 = inlined_call_operand.hbm [shape: f32[64,64], index: 2, kind: input, shape index: {}]   ;;  %s3976_s3 = inlined_call_operand.hbm [shape: f32[64,64], index: 3, kind: input, shape index: {}]   ;;  %s3977_s4 = inlined_call_operand.hbm [shape: f32[64,64], index: 4, kind: input, shape index: {}]   ;;  %s3978_s5 = inlined_call_operand.vmem [shape: f32[1,64], index: 5, kind: input, shape index: {}]   ;;  %s3979_s6 = inlined_call_operand.hbm [shape: f32[2,8,64], index: 6, kind: output, shape index: {}]  }
   0x1   :  { %12 = vsyncpa [#allocation6], 0 }
   0x2   :  { %13 = vsyncpa [#allocation9], 0 }
   0x3   :  { %14 = vsyncpa [#allocation4], 0  ;;  %s3462_s21 = smov [#allocation5]   ;;  %s3463_s23 = smov [#allocation8]  }
   0x4   :  { %s32_s22 = sshll.u32 %s3462_s21, 4  ;;  %s56_s24 = sshll.u32 %s3463_s23, 4  ;;  %s33_s22 = int_to_ptr.vmem [resolvable:$true] %s32_s22  ;;  %s3515_s24 = int_to_ptr.vmem [resolvable:$true] %s56_s24 }
   0x5   :  { %s3322_s27 = scalar_lea.hbm %s3974_s1, 1024 }
   0x6   :  { %p3323_p0 = scmp.ne.s32.totalorder %s3974_s1, %s3322_s27  ;;  %p3326_p1 = scmp.lt.u32.totalorder %s3322_s27, %s3974_s1 }
   0x8   :  { %p3328_p2 = pnand %p3326_p1, %p3323_p0 }
   0xa   :  { %3331 = shalt.err (!%p3328_p2)
}
   0xb   :  { %s3332_s8 = scalar_lea.vmem %s33_s22, 1024  ;;  %p3337_p4 = scmp.lt.s32.totalorder %s33_s22, %s33_s22 }
   0xc   :  { %p3333_p3 = scmp.ne.s32.totalorder %s33_s22, %s3332_s8  ;;  %p3338_p5 = scmp.lt.s32.totalorder %s3332_s8, %s3332_s8 }
   0xe   :  { %p3339_p6 = por %p3338_p5, %p3337_p4 }
  0x10   :  { %p3340_p7 = pnand %p3339_p6, %p3333_p3 }
  0x12   :  { %3343 = shalt.err (!%p3340_p7)
}
  0x13   :  { %s3464_s9 = smov 128   ;;  %s3465_s10 = smov 8  }
  0x14   :  { %38 = dma.hbm_to_vmem [thread:$0]  %s3974_s1, 1024, %s33_s22, [#allocation6], %s3464_s9, %s3464_s9, %s3465_s10  }
  0x15   :  { %s3344_s15 = scalar_lea.hbm %s3976_s3, 1024 }
  0x16   :  { %p3345_p8 = scmp.ne.s32.totalorder %s3976_s3, %s3344_s15  ;;  %p3348_p9 = scmp.lt.u32.totalorder %s3344_s15, %s3976_s3 }
  0x18   :  { %p3350_p10 = pnand %p3348_p9, %p3345_p8 }
  0x1a   :  { %3353 = shalt.err (!%p3350_p10)
}
  0x1b   :  { %s3354_s20 = scalar_lea.vmem %s3515_s24, 1024  ;;  %p3359_p12 = scmp.lt.s32.totalorder %s3515_s24, %s3515_s24 }
  0x1c   :  { %p3355_p11 = scmp.ne.s32.totalorder %s3515_s24, %s3354_s20  ;;  %p3360_p13 = scmp.lt.s32.totalorder %s3354_s20, %s3354_s20 }
  0x1e   :  { %p3361_p0 = por %p3360_p13, %p3359_p12 }
  0x20   :  { %p3362_p1 = pnand %p3361_p0, %p3355_p11 }
  0x22   :  { %3365 = shalt.err (!%p3362_p1)
}
  0x23   :  { %62 = dma.hbm_to_vmem [thread:$0]  %s3976_s3, 1024, %s3515_s24, [#allocation9], %s3464_s9, %s3464_s9, %s3465_s10  }
  0x24   :  { %s3466_s22 = smov [#allocation2]   ;;  %s3467_s25 = smov [#allocation7]  }
  0x25   :  { %s20_s23 = sshll.u32 %s3466_s22, 4  ;;  %s44_s26 = sshll.u32 %s3467_s25, 4  ;;  %s21_s23 = int_to_ptr.vmem [resolvable:$true] %s20_s23  ;;  %s3552_s26 = int_to_ptr.vmem [resolvable:$true] %s44_s26 }
  0x26   :  { %s3366_s29 = scalar_lea.hbm %s3973_s0, 256 }
  0x27   :  { %p3367_p2 = scmp.ne.s32.totalorder %s3973_s0, %s3366_s29  ;;  %p3370_p3 = scmp.lt.u32.totalorder %s3366_s29, %s3973_s0 }
  0x29   :  { %p3372_p4 = pnand %p3370_p3, %p3367_p2 }
  0x2b   :  { %3375 = shalt.err (!%p3372_p4)
}
  0x2c   :  { %s3376_s3 = scalar_lea.vmem %s21_s23, 256  ;;  %p3381_p6 = scmp.lt.s32.totalorder %s21_s23, %s21_s23 }
  0x2d   :  { %p3377_p5 = scmp.ne.s32.totalorder %s21_s23, %s3376_s3  ;;  %p3382_p7 = scmp.lt.s32.totalorder %s3376_s3, %s3376_s3 }
  0x2f   :  { %p3383_p8 = por %p3382_p7, %p3381_p6 }
  0x31   :  { %p3384_p9 = pnand %p3383_p8, %p3377_p5 }
  0x33   :  { %3387 = shalt.err (!%p3384_p9)
}
  0x34   :  { %26 = dma.hbm_to_vmem [thread:$0]  %s3973_s0, 256, %s21_s23, [#allocation3], %s3464_s9, %s3464_s9, %s3465_s10  }
  0x35   :  { %s3388_s15 = scalar_lea.hbm %s3975_s2, 1024 }
  0x36   :  { %p3389_p10 = scmp.ne.s32.totalorder %s3975_s2, %s3388_s15  ;;  %p3392_p11 = scmp.lt.u32.totalorder %s3388_s15, %s3975_s2 }
  0x38   :  { %p3394_p12 = pnand %p3392_p11, %p3389_p10 }
  0x3a   :  { %3397 = shalt.err (!%p3394_p12)
}
  0x3b   :  { %s3398_s20 = scalar_lea.vmem %s3552_s26, 1024  ;;  %p3403_p0 = scmp.lt.s32.totalorder %s3552_s26, %s3552_s26 }
  0x3c   :  { %p3399_p13 = scmp.ne.s32.totalorder %s3552_s26, %s3398_s20  ;;  %p3404_p1 = scmp.lt.s32.totalorder %s3398_s20, %s3398_s20 }
  0x3e   :  { %p3405_p2 = por %p3404_p1, %p3403_p0 }
  0x40   :  { %p3406_p3 = pnand %p3405_p2, %p3399_p13 }
  0x42   :  { %3409 = shalt.err (!%p3406_p3)
}
  0x43   :  { %50 = dma.hbm_to_vmem [thread:$0]  %s3975_s2, 1024, %s3552_s26, [#allocation6], %s3464_s9, %s3464_s9, %s3465_s10  }
  0x44   :  { %s3468_s21 = smov [#allocation10]   ;;  %s3410_s27 = scalar_lea.hbm %s3977_s4, 1024 }
  0x45   :  { %s68_s22 = sshll.u32 %s3468_s21, 4  ;;  %p3411_p4 = scmp.ne.s32.totalorder %s3977_s4, %s3410_s27  ;;  %s69_s22 = int_to_ptr.vmem [resolvable:$true] %s68_s22 }
  0x46   :  { %p3414_p5 = scmp.lt.u32.totalorder %s3410_s27, %s3977_s4 }
  0x48   :  { %p3416_p6 = pnand %p3414_p5, %p3411_p4 }
  0x4a   :  { %3419 = shalt.err (!%p3416_p6)
}
  0x4b   :  { %s3420_s8 = scalar_lea.vmem %s69_s22, 1024  ;;  %p3425_p8 = scmp.lt.s32.totalorder %s69_s22, %s69_s22 }
  0x4c   :  { %p3421_p7 = scmp.ne.s32.totalorder %s69_s22, %s3420_s8  ;;  %p3426_p9 = scmp.lt.s32.totalorder %s3420_s8, %s3420_s8 }
  0x4e   :  { %p3427_p10 = por %p3426_p9, %p3425_p8 }
  0x50   :  { %p3428_p11 = pnand %p3427_p10, %p3421_p7 }
  0x52   :  { %3431 = shalt.err (!%p3428_p11)
}
  0x53   :  { %74 = dma.hbm_to_vmem [thread:$0]  %s3977_s4, 1024, %s69_s22, [#allocation9], %s3464_s9, %s3464_s9, %s3465_s10  }
  0x54   :  { %3454 = dma.done.wait [#allocation3], 256  }
  0x55   :  { %3455 = vsyncadd [#allocation3], 4294967040 }
  0x56   :  { %3456 = dma.done.wait [#allocation6], 2048  }
  0x57   :  { %3457 = vsyncadd [#allocation6], 4294965248 }
  0x58   :  { %3458 = dma.done.wait [#allocation9], 2048  }
  0x59   :  { %3459 = vsyncadd [#allocation9], 4294965248  ;;  %v186_v0 = vld [vmem:[#allocation7] sm:$0xff]  ;;  %v187_v1 = vld [vmem:[#allocation7 + $0x8] sm:$0xff]  ;;  %vm102_vm0 = vcmask 523264   ;;  %s3469_s4 = smov 80   ;;  %v377_v49 = vlaneseq }
  0x5a   :  { %v94_v2 = vld [vmem:[#allocation5] sm:$0xff]  ;;  %v3224_v3 = vpack.c.bf16 %v187_v1, %v186_v0  ;;  %v95_v4 = vld [vmem:[#allocation5 + $0x8] sm:$0xff]  ;;  %v188_v5 = vld [vmem:[#allocation7 + $0x10] sm:$0xff]  ;;  %s3470_s11 = smov 112   ;;  %s3471_s3 = smov 96   ;;  %v3472_v44 = vmov 0.0  }
  0x5b   :  { %v189_v6 = vld [vmem:[#allocation7 + $0x18] sm:$0xff]  ;;  %v3208_v7 = vpack.c.bf16 %v95_v4, %v94_v2  ;;  %v96_v9 = vld [vmem:[#allocation5 + $0x10] sm:$0xff]  ;;  %v190_v11 = vld [vmem:[#allocation7 + $0x20] sm:$0xff]  ;;  %vm3473_vm1 = vmmov 0   ;;  %v3474_v47 = vmov 1983009808  }
  0x5c   :  { %v3228_v8 = vpack.c.bf16 %v189_v6, %v188_v5  ;;  %v97_v10 = vld [vmem:[#allocation5 + $0x18] sm:$0xff]  ;;  %3225 = vmatprep.subr.bf16.mxu1 %v3224_v3  ;;  %v191_v13 = vld [vmem:[#allocation7 + $0x28] sm:$0xff]  ;;  %v98_v14 = vld [vmem:[#allocation5 + $0x20] sm:$0xff]  ;;  %v375_v48 = vunpack.c.l.s4 %v3474_v47  ;;  %v378_v51 = vshrl.u32 %v377_v49, 7  ;;  %v3475_v54 = vmov 1934713408  }
  0x5d   :  { %v3212_v12 = vpack.c.bf16 %v97_v10, %v96_v9  ;;  %v99_v15 = vld [vmem:[#allocation5 + $0x28] sm:$0xff]  ;;  %3209 = vmatprep.subr.bf16.mxu0 %v3208_v7  ;;  %3227 = vmatpush3.bf16.msra.mxu1 %v3224_v3  ;;  %v3232_v16 = vpack.c.bf16 %v191_v13, %v190_v11  ;;  %v92_v17 = vld [vmem:[#allocation2] sm:$0xff]  ;;  %v193_v20 = vld [vmem:[#allocation7 + $0x38] sm:$0xff]  ;;  %v407_v55 = vunpack.c.l.s4 %v3475_v54  ;;  %vm1228_vm2 = vcmask 130048   ;;  %s3476_s24 = smov 16   ;;  %s3477_s12 = smov 32  }
  0x5e   :  { %3211 = vmatpush3.bf16.msra.mxu0 %v3208_v7  ;;  %3229 = vmatprep.subr.bf16.mxu1 %v3228_v8  ;;  %v3216_v18 = vpack.c.bf16 %v99_v15, %v98_v14  ;;  %v192_v19 = vld [vmem:[#allocation7 + $0x30] sm:$0xff]  ;;  %v101_v22 = vld [vmem:[#allocation5 + $0x38] sm:$0xff]  ;;  %v269_v25 = vld [vmem:[#allocation8] sm:$0xff]  ;;  %v376_v50 = vunpack.c.0.s8 %v375_v48  ;;  %vm1837_vm3 = vcmask 64512   ;;  %s3478_s13 = smov 48   ;;  %vm2808_vm4 = vcmask 261120  }
  0x5f   :  { %3213 = vmatprep.subr.bf16.mxu0 %v3212_v12  ;;  %3087 = vmatprep.mubr.msk.f32.mxu1 %vm102_vm0, %v92_v17  ;;  %v100_v21 = vld [vmem:[#allocation5 + $0x30] sm:$0xff]  ;;  %v3236_v23 = vpack.c.bf16 %v193_v20, %v192_v19  ;;  %v270_v26 = vld [vmem:[#allocation8 + $0x8] sm:$0xff]  ;;  %v272_v29 = vld [vmem:[#allocation8 + $0x18] sm:$0xff]  ;;  %v408_v59 = vunpack.c.0.s8 %v407_v55  ;;  %vm2811_vm5 = vcmask 392192   ;;  %s3479_s16 = smov [#allocation11]  }
  0x60   :  { %3068 = vmatprep.mubr.msk.f32.mxu0 %vm102_vm0, %v92_v17  ;;  %v3220_v24 = vpack.c.bf16 %v101_v22, %v100_v21  ;;  %v3240_v27 = vpack.c.bf16 %v270_v26, %v269_v25  ;;  %v271_v28 = vld [vmem:[#allocation8 + $0x10] sm:$0xff]  ;;  %v93_v30 = vld [vmem:[#allocation2 + $0x8] sm:$0xff]  ;;  %v273_v32 = vld [vmem:[#allocation8 + $0x20] sm:$0xff]  ;;  %v3648_v56 = vsub.s32 %v376_v50, %v378_v51  ;;  %s2917_s17 = sshll.u32 %s3479_s16, 4  ;;  %s2918_s17 = int_to_ptr.vmem [resolvable:$true] %s2917_s17 }
  0x61   :  { %3231 = vmatpush3.bf16.msra.mxu1 %v3228_v8  ;;  %v3244_v31 = vpack.c.bf16 %v272_v29, %v271_v28  ;;  %v274_v33 = vld [vmem:[#allocation8 + $0x28] sm:$0xff]  ;;  %v275_v35 = vld [vmem:[#allocation8 + $0x30] sm:$0xff]  ;;  %v276_v36 = vld [vmem:[#allocation8 + $0x38] sm:$0xff]  ;;  %v3654_v4 = vsub.s32 %v408_v59, %v378_v51  ;;  %s3432_s18 = scalar_lea.vmem %s2918_s17, 256  ;;  %p3437_p13 = scmp.lt.s32.totalorder %s2918_s17, %s2918_s17 }
  0x62   :  { %3215 = vmatpush3.bf16.msra.mxu0 %v3212_v12  ;;  %3233 = vmatprep.subr.bf16.mxu1 %v3232_v16  ;;  %v3248_v34 = vpack.c.bf16 %v274_v33, %v273_v32  ;;  %v3252_v37 = vpack.c.bf16 %v276_v36, %v275_v35  ;;  %p3433_p12 = scmp.ne.s32.totalorder %s2918_s17, %s3432_s18  ;;  %p3438_p0 = scmp.lt.s32.totalorder %s3432_s18, %s3432_s18 }
  0x63   :  { %3217 = vmatprep.subr.bf16.mxu0 %v3216_v18 }
  0x64   :  { %p3439_p1 = por %p3438_p0, %p3437_p13 }
  0x65   :  { %3235 = vmatpush3.bf16.msra.mxu1 %v3232_v16 }
  0x66   :  { %3219 = vmatpush3.bf16.msra.mxu0 %v3216_v18  ;;  %3237 = vmatprep.subr.bf16.mxu1 %v3236_v23  ;;  %p3440_p2 = pnand %p3439_p1, %p3433_p12 }
  0x67   :  { %3221 = vmatprep.subr.bf16.mxu0 %v3220_v24 }
  0x69   :  { %3239 = vmatpush3.bf16.msra.mxu1 %v3236_v23 }
  0x6a   :  { %3223 = vmatpush3.bf16.msra.mxu0 %v3220_v24  ;;  %3109 = vmatprep.subr.mxu1 %v3472_v44 }
  0x6b   :  { %3241 = vmatprep.subr.bf16.mxu0 %v3240_v27 }
  0x6c   :  { %3088 = vmatmul.mubr.msk.f32.vlgmr.msra.gmra.mrb[0].mxu1 %vm102_vm0, %v93_v30 }
  0x6d   :  { %3069 = vmatmul.mubr.msk.f32.vlgmr.msra.gmra.mrb[0].mxu0 %vm102_vm0, %v93_v30  ;;  %3111 = vmatprep.mubr.msk.f32.mxu1 %vm3473_vm1, %v3472_v44 }
  0x6e   :  { %3243 = vmatpush3.bf16.msra.mxu0 %v3240_v27  ;;  %3106 = vmatprep.mubr.msk.f32.mxu0 %vm102_vm0, %v92_v17 }
  0x6f   :  { %3245 = vmatprep.subr.bf16.mxu0 %v3244_v31 }
  0x72   :  { %3247 = vmatpush3.bf16.msra.mxu0 %v3244_v31 }
  0x73   :  { %3249 = vmatprep.subr.bf16.mxu0 %v3248_v34 }
  0x76   :  { %3251 = vmatpush3.bf16.msra.mxu0 %v3248_v34 }
  0x77   :  { %3253 = vmatprep.subr.bf16.mxu0 %v3252_v37 }
  0x7a   :  { %3255 = vmatpush3.bf16.msra.mxu0 %v3252_v37 }
  0x7b   :  { %3149 = vmatprep.subr.mxu0 %v3472_v44 }
  0x7d   :  { %3107 = vmatmul.mubr.msk.f32.vlgmr.msra.gmra.mrb[2].mxu0 %vm102_vm0, %v93_v30 }
  0x7e   :  { %3151 = vmatprep.mubr.msk.f32.mxu0 %vm3473_vm1, %v3472_v44 }
 0x13f   :  { %v3610_v38 = vpop.f32.mrb[0].mxu1 }
 0x140   :  { %v3070_v39 = vpop.f32.mrb[0].mxu0  ;;  %v260_v40 = vpop.f32.mrb[1].mxu1 }
 0x141   :  { %658 = vrot.lane.b32.xlu1 %v260_v40, %s3469_s4  ;;  %646 = vrot.lane.b32.xlu0 %v260_v40, %s3470_s11  ;;  %v175_v41 = vpop.f32.mrb[1].mxu0  ;;  %v3622_v43 = vmul.f32 0.125, %v3070_v39 }
 0x142   :  { %v184_v42 = vmul.f32 0.125, %v175_v41 }
 0x145   :  { %652 = vrot.lane.b32.xlu0 %v260_v40, %s3471_s3  ;;  %354 = vrot.lane.b32.xlu1 %v184_v42, %s3470_s11 }
 0x149   :  { %360 = vrot.lane.b32.xlu0 %v184_v42, %s3471_s3  ;;  %366 = vrot.lane.b32.xlu1 %v184_v42, %s3469_s4 }
 0x14d   :  { %648 = vrot.lane.b32.xlu0 %v3610_v38, %s3470_s11  ;;  %654 = vrot.lane.b32.xlu1 %v3610_v38, %s3471_s3 }
 0x150   :  { %v3638_v45 = vpop.f32.mrb[2].mxu0 }
 0x151   :  { %660 = vrot.lane.b32.xlu0 %v3610_v38, %s3469_s4  ;;  %356 = vrot.lane.b32.xlu1 %v3622_v43, %s3470_s11  ;;  %v3640_v46 = vpop.f32.mrb[3].mxu0 }
 0x155   :  { %362 = vrot.lane.b32.xlu0 %v3622_v43, %s3471_s3  ;;  %368 = vrot.lane.b32.xlu1 %v3622_v43, %s3469_s4 }
 0x159   :  { %938 = vrot.lane.b32.xlu1 %v3640_v46, %s3470_s11  ;;  %944 = vrot.lane.b32.xlu0 %v3640_v46, %s3471_s3 }
 0x15d   :  { %950 = vrot.lane.b32.xlu1 %v3640_v46, %s3469_s4 }
 0x1b3   :  { %v659_v52 = vpop.permute.xlu1 %658  ;;  %v647_v53 = vpop.permute.xlu0 %646 }
 0x1b4   :  { %v680_v57 = vcombine.low %v647_v53, %v659_v52  ;;  %v681_v58 = vcombine.high %v647_v53, %v659_v52 }
 0x1b6   :  { %v688_v0 = vrot.slane %v680_v57, %v3648_v56  ;;  %v695_v1 = vrot.slane %v681_v58, %v3648_v56 }
 0x1b7   :  { %v653_v60 = vpop.permute.xlu0 %652  ;;  %v355_v61 = vpop.permute.xlu1 %354 }
 0x1b8   :  { %v664_v62 = vcombine.low %v260_v40, %v653_v60  ;;  %v665_v63 = vcombine.high %v260_v40, %v653_v60 }
 0x1ba   :  { %v672_v2 = vrot.slane %v664_v62, %v3648_v56  ;;  %v679_v3 = vrot.slane %v665_v63, %v3648_v56 }
 0x1bb   :  { %v361_v5 = vpop.permute.xlu0 %360  ;;  %v367_v6 = vpop.permute.xlu1 %366 }
 0x1bc   :  { %v696_v7 = vcombine.low %v672_v2, %v688_v0  ;;  %v697_v8 = vcombine.high %v672_v2, %v688_v0  ;;  %v712_v9 = vcombine.low %v679_v3, %v695_v1  ;;  %v713_v10 = vcombine.high %v679_v3, %v695_v1 }
 0x1bd   :  { %v372_v11 = vcombine.low %v184_v42, %v361_v5  ;;  %v373_v12 = vcombine.high %v184_v42, %v361_v5  ;;  %v388_v13 = vcombine.low %v355_v61, %v367_v6  ;;  %v389_v14 = vcombine.high %v355_v61, %v367_v6 }
 0x1be   :  { %v704_v21 = vrot.slane %v696_v7, %v3654_v4  ;;  %v711_v22 = vrot.slane %v697_v8, %v3654_v4  ;;  %v720_v23 = vrot.slane %v712_v9, %v3654_v4  ;;  %v727_v24 = vrot.slane %v713_v10, %v3654_v4 }
 0x1bf   :  { %v380_v15 = vrot.slane %v372_v11, %v3648_v56  ;;  %v387_v16 = vrot.slane %v373_v12, %v3648_v56  ;;  %v396_v17 = vrot.slane %v388_v13, %v3648_v56  ;;  %v403_v18 = vrot.slane %v389_v14, %v3648_v56  ;;  %v649_v19 = vpop.permute.xlu0 %648  ;;  %v655_v20 = vpop.permute.xlu1 %654 }
 0x1c0   :  { %v800_v35 = vcombine.low %v704_v21, %v711_v22  ;;  %v2941_v36 = vcombine.high %v704_v21, %v711_v22  ;;  %v816_v37 = vcombine.low %v720_v23, %v727_v24  ;;  %v2942_v39 = vcombine.high %v720_v23, %v727_v24 }
 0x1c1   :  { %v404_v25 = vcombine.low %v380_v15, %v396_v17  ;;  %v405_v26 = vcombine.high %v380_v15, %v396_v17  ;;  %v420_v27 = vcombine.low %v387_v16, %v403_v18  ;;  %v421_v28 = vcombine.high %v387_v16, %v403_v18 }
 0x1c2   :  { %v732_v48 = vcombine.low %v3610_v38, %v655_v20  ;;  %v733_v49 = vcombine.high %v3610_v38, %v655_v20  ;;  %v3671_v52 = vrot.slane %v800_v35, %v3648_v56  ;;  %v3674_v53 = vrot.slane %v2941_v36, %v3648_v56 }
 0x1c3   :  { %v412_v29 = vrot.slane %v404_v25, %v3654_v4  ;;  %v419_v30 = vrot.slane %v405_v26, %v3654_v4  ;;  %v428_v31 = vrot.slane %v420_v27, %v3654_v4  ;;  %v435_v32 = vrot.slane %v421_v28, %v3654_v4  ;;  %v661_v33 = vpop.permute.xlu0 %660  ;;  %v357_v34 = vpop.permute.xlu1 %356 }
 0x1c4   :  { %v748_v50 = vcombine.low %v649_v19, %v661_v33  ;;  %v749_v51 = vcombine.high %v649_v19, %v661_v33  ;;  %v3679_v59 = vrot.slane %v816_v37, %v3648_v56  ;;  %v3682_v60 = vrot.slane %v2942_v39, %v3648_v56 }
 0x1c5   :  { %v508_v40 = vcombine.low %v412_v29, %v419_v30  ;;  %v2937_v41 = vcombine.high %v412_v29, %v419_v30  ;;  %v524_v42 = vcombine.low %v428_v31, %v435_v32  ;;  %v2938_v47 = vcombine.high %v428_v31, %v435_v32 }
 0x1c6   :  { %v756_v54 = vrot.slane %v748_v50, %v3648_v56  ;;  %v763_v55 = vrot.slane %v749_v51, %v3648_v56  ;;  %v740_v0 = vrot.slane %v732_v48, %v3648_v56  ;;  %v747_v1 = vrot.slane %v733_v49, %v3648_v56 }
 0x1c7   :  { %v363_v57 = vpop.permute.xlu0 %362  ;;  %v369_v58 = vpop.permute.xlu1 %368  ;;  %v3685_v38 = vrot.slane %v508_v40, %v3648_v56  ;;  %v3688_v61 = vrot.slane %v2937_v41, %v3648_v56  ;;  %v3691_v62 = vrot.slane %v524_v42, %v3648_v56  ;;  %v3694_v63 = vrot.slane %v2938_v47, %v3648_v56 }
 0x1c8   :  { %v440_v2 = vcombine.low %v3622_v43, %v363_v57  ;;  %v441_v3 = vcombine.high %v3622_v43, %v363_v57  ;;  %v456_v5 = vcombine.low %v357_v34, %v369_v58  ;;  %v457_v6 = vcombine.high %v357_v34, %v369_v58 }
 0x1c9   :  { %v764_v7 = vcombine.low %v740_v0, %v756_v54  ;;  %v765_v8 = vcombine.high %v740_v0, %v756_v54  ;;  %v780_v9 = vcombine.low %v747_v1, %v763_v55  ;;  %v781_v10 = vcombine.high %v747_v1, %v763_v55 }
 0x1ca   :  { %v448_v11 = vrot.slane %v440_v2, %v3648_v56  ;;  %v455_v12 = vrot.slane %v441_v3, %v3648_v56  ;;  %v464_v13 = vrot.slane %v456_v5, %v3648_v56  ;;  %v471_v14 = vrot.slane %v457_v6, %v3648_v56 }
 0x1cb   :  { %v832_v43 = vcombine.low %v3671_v52, %v3674_v53  ;;  %v848_v19 = vcombine.low %v3679_v59, %v3682_v60  ;;  %v540_v20 = vcombine.low %v3685_v38, %v3688_v61  ;;  %v556_v21 = vcombine.low %v3691_v62, %v3694_v63 }
 0x1cc   :  { %v472_v15 = vcombine.low %v448_v11, %v464_v13  ;;  %v473_v16 = vcombine.high %v448_v11, %v464_v13  ;;  %v488_v17 = vcombine.low %v455_v12, %v471_v14  ;;  %v489_v18 = vcombine.high %v455_v12, %v471_v14 }
 0x1cd   :  { %v772_v22 = vrot.slane %v764_v7, %v3654_v4  ;;  %v779_v23 = vrot.slane %v765_v8, %v3654_v4  ;;  %v788_v24 = vrot.slane %v780_v9, %v3654_v4  ;;  %v795_v25 = vrot.slane %v781_v10, %v3654_v4 }
 0x1ce   :  { %v480_v26 = vrot.slane %v472_v15, %v3654_v4  ;;  %v487_v27 = vrot.slane %v473_v16, %v3654_v4  ;;  %v496_v28 = vrot.slane %v488_v17, %v3654_v4  ;;  %v503_v29 = vrot.slane %v489_v18, %v3654_v4 }
 0x1cf   :  { %v840_v30 = vrot.slane %v832_v43, %v3654_v4  ;;  %v856_v31 = vrot.slane %v848_v19, %v3654_v4  ;;  %v548_v32 = vrot.slane %v540_v20, %v3654_v4  ;;  %v564_v33 = vrot.slane %v556_v21, %v3654_v4 }
 0x1d0   :  { %v868_v34 = vcombine.low %v772_v22, %v779_v23  ;;  %v2943_v35 = vcombine.high %v772_v22, %v779_v23  ;;  %v884_v36 = vcombine.low %v788_v24, %v795_v25  ;;  %v833_v37 = vcombine.high %v3671_v52, %v3674_v53 }
 0x1d1   :  { %v849_v39 = vcombine.high %v3679_v59, %v3682_v60  ;;  %v2944_v40 = vcombine.high %v788_v24, %v795_v25  ;;  %v864_v41 = vcombine.low %v840_v30, %v856_v31  ;;  %v541_v42 = vcombine.high %v3685_v38, %v3688_v61  ;;  %v939_v24 = vpop.permute.xlu1 %938  ;;  %v945_v25 = vpop.permute.xlu0 %944 }
 0x1d2   :  { %v572_v47 = vcombine.low %v548_v32, %v564_v33  ;;  %v557_v48 = vcombine.high %v3691_v62, %v3694_v63  ;;  %v576_v49 = vcombine.low %v480_v26, %v487_v27  ;;  %v2939_v50 = vcombine.high %v480_v26, %v487_v27 }
 0x1d3   :  { %v592_v51 = vcombine.low %v496_v28, %v503_v29  ;;  %3110 = vmatpush3.xpose.msk.msra.mxu1 %vm1228_vm2, %v864_v41  ;;  %v875_v54 = vrot.slane %v868_v34, %v3648_v56  ;;  %v883_v52 = vrot.slane %v2943_v35, %v3648_v56  ;;  %v891_v53 = vrot.slane %v884_v36, %v3648_v56 }
 0x1d4   :  { %v2940_v55 = vcombine.high %v496_v28, %v503_v29  ;;  %3114 = vmatprep.subr.mxu1 %v3472_v44  ;;  %v899_v57 = vrot.slane %v2944_v40, %v3648_v56  ;;  %v865_v58 = vcombine.high %v840_v30, %v856_v31  ;;  %v847_v59 = vrot.slane %v833_v37, %v3654_v4 }
 0x1d5   :  { %v863_v60 = vrot.slane %v849_v39, %v3654_v4  ;;  %v583_v38 = vrot.slane %v576_v49, %v3648_v56  ;;  %v591_v61 = vrot.slane %v2939_v50, %v3648_v56  ;;  %v599_v62 = vrot.slane %v592_v51, %v3648_v56 }
 0x1d6   :  { %3112 = vmatmul.mubr.msk.f32.vlgmr.msra.gmra.mrb[2].mxu1 %vm1228_vm2, %v572_v47  ;;  %v607_v63 = vrot.slane %v2940_v55, %v3648_v56  ;;  %v573_v0 = vcombine.high %v548_v32, %v564_v33  ;;  %v555_v1 = vrot.slane %v541_v42, %v3654_v4  ;;  %v571_v2 = vrot.slane %v557_v48, %v3654_v4  ;;  %v951_v33 = vpop.permute.xlu1 %950 }
 0x1d7   :  { %3115 = vmatpush3.xpose.msk.msra.mxu1 %vm1228_vm2, %v865_v58  ;;  %3116 = vmatprep.mubr.msk.f32.mxu1 %vm3473_vm1, %v3472_v44  ;;  %v900_v3 = vcombine.low %v875_v54, %v883_v52  ;;  %v916_v5 = vcombine.low %v891_v53, %v899_v57  ;;  %v866_v6 = vcombine.low %v847_v59, %v863_v60 }
 0x1d8   :  { %3119 = vmatprep.subr.mxu1 %v3472_v44  ;;  %v608_v7 = vcombine.low %v583_v38, %v591_v61  ;;  %v624_v8 = vcombine.low %v599_v62, %v607_v63  ;;  %v574_v9 = vcombine.low %v555_v1, %v571_v2  ;;  %v867_v10 = vcombine.high %v847_v59, %v863_v60 }
 0x1d9   :  { %v908_v11 = vrot.slane %v900_v3, %v3654_v4  ;;  %v924_v12 = vrot.slane %v916_v5, %v3654_v4  ;;  %v575_v13 = vcombine.high %v555_v1, %v571_v2  ;;  %v901_v16 = vcombine.high %v875_v54, %v883_v52 }
 0x1da   :  { %3117 = vmatmul.mubr.msk.f32.vlgmr.msra.gmra.mrb[4].mxu1 %vm1228_vm2, %v573_v0  ;;  %v616_v14 = vrot.slane %v608_v7, %v3654_v4  ;;  %v632_v15 = vrot.slane %v624_v8, %v3654_v4  ;;  %v917_v17 = vcombine.high %v891_v53, %v899_v57  ;;  %v609_v43 = vcombine.high %v583_v38, %v591_v61 }
 0x1db   :  { %3120 = vmatpush3.xpose.msk.msra.mxu1 %vm1228_vm2, %v866_v6  ;;  %3121 = vmatprep.mubr.msk.f32.mxu1 %vm3473_vm1, %v3472_v44  ;;  %v932_v18 = vcombine.low %v908_v11, %v924_v12  ;;  %v625_v19 = vcombine.high %v599_v62, %v607_v63  ;;  %v933_v21 = vcombine.high %v908_v11, %v924_v12 }
 0x1dc   :  { %3124 = vmatprep.subr.mxu1 %v3472_v44  ;;  %v640_v20 = vcombine.low %v616_v14, %v632_v15  ;;  %v915_v22 = vrot.slane %v901_v16, %v3654_v4  ;;  %v931_v23 = vrot.slane %v917_v17, %v3654_v4  ;;  %v956_v26 = vcombine.low %v3640_v46, %v945_v25 }
 0x1dd   :  { %v957_v27 = vcombine.high %v3640_v46, %v945_v25  ;;  %v641_v28 = vcombine.high %v616_v14, %v632_v15  ;;  %v623_v29 = vrot.slane %v609_v43, %v3654_v4  ;;  %v639_v30 = vrot.slane %v625_v19, %v3654_v4 }
 0x1de   :  { %3122 = vmatmul.mubr.msk.f32.vlgmr.msra.gmra.mrb[6].mxu1 %vm1228_vm2, %v574_v9  ;;  %v934_v31 = vcombine.low %v915_v22, %v931_v23  ;;  %v964_v32 = vrot.slane %v956_v26, %v3648_v56  ;;  %v972_v34 = vcombine.low %v939_v24, %v951_v33  ;;  %v973_v35 = vcombine.high %v939_v24, %v951_v33 }
 0x1df   :  { %3125 = vmatpush3.xpose.msk.msra.mxu1 %vm1228_vm2, %v867_v10  ;;  %3126 = vmatprep.mubr.msk.f32.mxu1 %vm3473_vm1, %v3472_v44  ;;  %v971_v46 = vrot.slane %v957_v27, %v3648_v56  ;;  %v642_v36 = vcombine.low %v623_v29, %v639_v30  ;;  %v935_v37 = vcombine.high %v915_v22, %v931_v23 }
 0x1e0   :  { %3129 = vmatprep.subr.mxu1 %v3472_v44  ;;  %v980_v39 = vrot.slane %v972_v34, %v3648_v56  ;;  %v987_v40 = vrot.slane %v973_v35, %v3648_v56  ;;  %v643_v48 = vcombine.high %v623_v29, %v639_v30 }
 0x1e2   :  { %3127 = vmatmul.mubr.msk.f32.vlgmr.msra.gmra.mrb[8].mxu1 %vm1228_vm2, %v575_v13  ;;  %v988_v41 = vcombine.low %v964_v32, %v980_v39  ;;  %v989_v42 = vcombine.high %v964_v32, %v980_v39  ;;  %v1004_v47 = vcombine.low %v971_v46, %v987_v40  ;;  %v1005_v49 = vcombine.high %v971_v46, %v987_v40 }
 0x1e3   :  { %3130 = vmatpush3.xpose.msk.msra.mxu1 %vm1228_vm2, %v932_v18  ;;  %3131 = vmatprep.mubr.msk.f32.mxu1 %vm3473_vm1, %v3472_v44 }
 0x1e4   :  { %3134 = vmatprep.subr.mxu1 %v3472_v44  ;;  %v996_v50 = vrot.slane %v988_v41, %v3654_v4  ;;  %v1003_v51 = vrot.slane %v989_v42, %v3654_v4  ;;  %v1012_v54 = vrot.slane %v1004_v47, %v3654_v4  ;;  %v1019_v52 = vrot.slane %v1005_v49, %v3654_v4 }
 0x1e6   :  { %3132 = vmatmul.mubr.msk.f32.vlgmr.msra.gmra.mrb[10].mxu1 %vm1228_vm2, %v640_v20  ;;  %v1092_v53 = vcombine.low %v996_v50, %v1003_v51  ;;  %v2945_v55 = vcombine.high %v996_v50, %v1003_v51  ;;  %v1108_v57 = vcombine.low %v1012_v54, %v1019_v52  ;;  %v2946_v58 = vcombine.high %v1012_v54, %v1019_v52 }
 0x1e7   :  { %3135 = vmatpush3.xpose.msk.msra.mxu1 %vm1228_vm2, %v933_v21  ;;  %3136 = vmatprep.mubr.msk.f32.mxu1 %vm3473_vm1, %v3472_v44 }
 0x1e8   :  { %3139 = vmatprep.subr.mxu1 %v3472_v44  ;;  %v1099_v59 = vrot.slane %v1092_v53, %v3648_v56  ;;  %v1107_v60 = vrot.slane %v2945_v55, %v3648_v56  ;;  %v1115_v38 = vrot.slane %v1108_v57, %v3648_v56  ;;  %v1123_v61 = vrot.slane %v2946_v58, %v3648_v56 }
 0x1ea   :  { %3137 = vmatmul.mubr.msk.f32.vlgmr.msra.gmra.mrb[12].mxu1 %vm1228_vm2, %v641_v28  ;;  %v1124_v62 = vcombine.low %v1099_v59, %v1107_v60  ;;  %v1140_v63 = vcombine.low %v1115_v38, %v1123_v61  ;;  %v1125_v5 = vcombine.high %v1099_v59, %v1107_v60  ;;  %v1141_v6 = vcombine.high %v1115_v38, %v1123_v61 }
 0x1eb   :  { %3140 = vmatpush3.xpose.msk.msra.mxu1 %vm1228_vm2, %v934_v31  ;;  %3141 = vmatprep.mubr.msk.f32.mxu1 %vm3473_vm1, %v3472_v44 }
 0x1ec   :  { %3144 = vmatprep.subr.mxu1 %v3472_v44  ;;  %v1132_v0 = vrot.slane %v1124_v62, %v3654_v4  ;;  %v1148_v1 = vrot.slane %v1140_v63, %v3654_v4  ;;  %v3811_v7 = vrot.slane %v1125_v5, %v3654_v4  ;;  %v3814_v8 = vrot.slane %v1141_v6, %v3654_v4 }
 0x1ee   :  { %3142 = vmatmul.mubr.msk.f32.vlgmr.msra.gmra.mrb[14].mxu1 %vm1228_vm2, %v642_v36  ;;  %v1156_v2 = vcombine.low %v1132_v0, %v1148_v1  ;;  %v1157_v3 = vcombine.high %v1132_v0, %v1148_v1  ;;  %v1158_v9 = vcombine.low %v3811_v7, %v3814_v8  ;;  %v1159_v10 = vcombine.high %v3811_v7, %v3814_v8 }
 0x1ef   :  { %3145 = vmatpush3.xpose.msk.msra.mxu1 %vm1228_vm2, %v935_v37  ;;  %3146 = vmatprep.mubr.msk.f32.mxu1 %vm3473_vm1, %v3472_v44 }
 0x1f0   :  { %3154 = vmatprep.subr.mxu1 %v3472_v44  ;;  %3150 = vmatpush3.msra.mxu0 %v1156_v2 }
 0x1f1   :  { %3159 = vmatprep.subr.mxu0 %v3472_v44 }
 0x1f2   :  { %3147 = vmatmul.mubr.msk.f32.vlgmr.msra.gmra.mrb[16].mxu1 %vm1228_vm2, %v643_v48 }
 0x1f3   :  { %3156 = vmatprep.mubr.msk.f32.mxu1 %vm3473_vm1, %v3472_v44  ;;  %3155 = vmatpush3.msra.mxu1 %v1157_v3 }
 0x1f4   :  { %3164 = vmatprep.subr.mxu1 %v3472_v44 }
 0x2a9   :  { %v1301_v11 = vpop.f32.mrb[2].mxu1 }
 0x2aa   :  { %v3113_v12 = vpop.f32.mrb[3].mxu1  ;;  %v1838_v13 = vsel %vm1837_vm3, %v1301_v11, -inf }
 0x2ab   :  { %1839 = vmax.xlane.f32.xlu0 %v1838_v13 }
 0x2ad   :  { %v1377_v14 = vpop.f32.mrb[4].mxu1 }
 0x2ae   :  { %v3118_v15 = vpop.f32.mrb[5].mxu1  ;;  %v1841_v16 = vsel %vm1837_vm3, %v1377_v14, -inf }
 0x2af   :  { %1842 = vmax.xlane.f32.xlu1 %v1841_v16 }
 0x2b1   :  { %v1453_v17 = vpop.f32.mrb[6].mxu1 }
 0x2b2   :  { %v3123_v18 = vpop.f32.mrb[7].mxu1  ;;  %v1844_v43 = vsel %vm1837_vm3, %v1453_v17, -inf }
 0x2b3   :  { %1845 = vmax.xlane.f32.xlu0 %v1844_v43 }
 0x2b5   :  { %v1529_v19 = vpop.f32.mrb[8].mxu1 }
 0x2b6   :  { %v3128_v20 = vpop.f32.mrb[9].mxu1  ;;  %v1847_v21 = vsel %vm1837_vm3, %v1529_v19, -inf }
 0x2b7   :  { %1848 = vmax.xlane.f32.xlu0 %v1847_v21 }
 0x2b9   :  { %v1605_v22 = vpop.f32.mrb[10].mxu1 }
 0x2ba   :  { %v3133_v23 = vpop.f32.mrb[11].mxu1  ;;  %v1850_v24 = vsel %vm1837_vm3, %v1605_v22, -inf }
 0x2bb   :  { %1851 = vmax.xlane.f32.xlu1 %v1850_v24 }
 0x2bd   :  { %v1681_v25 = vpop.f32.mrb[12].mxu1 }
 0x2be   :  { %v3138_v26 = vpop.f32.mrb[13].mxu1  ;;  %v1853_v27 = vsel %vm1837_vm3, %v1681_v25, -inf }
 0x2bf   :  { %1854 = vmax.xlane.f32.xlu0 %v1853_v27 }
 0x2c1   :  { %v1757_v28 = vpop.f32.mrb[14].mxu1 }
 0x2c2   :  { %v3143_v29 = vpop.f32.mrb[15].mxu1  ;;  %v1856_v30 = vsel %vm1837_vm3, %v1757_v28, -inf }
 0x2c3   :  { %1857 = vmax.xlane.f32.xlu1 %v1856_v30 }
 0x2c5   :  { %v3827_v31 = vpop.f32.mrb[16].mxu1 }
 0x2c6   :  { %v3148_v32 = vpop.f32.mrb[17].mxu1  ;;  %v1859_v33 = vsel %vm1837_vm3, %v3827_v31, -inf }
 0x2c7   :  { %1860 = vmax.xlane.f32.xlu0 %v1859_v33 }
 0x2d4   :  { %946 = vrot.lane.b32.xlu1 %v3638_v45, %s3471_s3 }
 0x2d8   :  { %952 = vrot.lane.b32.xlu1 %v3638_v45, %s3469_s4 }
 0x2dd   :  { %940 = vrot.lane.b32.xlu0 %v3638_v45, %s3470_s11 }
 0x338   :  { %v1840_v46 = vpop.xlane.xlu0 %1839 }
 0x339   :  { %v1862_v34 = vsub.f32 %v1301_v11, %v1840_v46 }
 0x33b   :  { %v1870_v35 = vmul.f32 1.442695, %v1862_v34 }
 0x33c   :  { %v1843_v36 = vpop.xlane.xlu1 %1842 }
 0x33d   :  { %3290 = vpow2.f32 %v1870_v35  ;;  %v1863_v37 = vsub.f32 %v1377_v14, %v1843_v36 }
 0x33f   :  { %v1872_v39 = vmul.f32 1.442695, %v1863_v37 }
 0x340   :  { %v1846_v40 = vpop.xlane.xlu0 %1845 }
 0x341   :  { %3292 = vpow2.f32 %v1872_v39  ;;  %v1864_v41 = vsub.f32 %v1453_v17, %v1846_v40 }
 0x343   :  { %v1874_v42 = vmul.f32 1.442695, %v1864_v41 }
 0x344   :  { %v1849_v47 = vpop.xlane.xlu0 %1848 }
 0x345   :  { %3294 = vpow2.f32 %v1874_v42  ;;  %v1865_v48 = vsub.f32 %v1529_v19, %v1849_v47 }
 0x347   :  { %v3291_v49 = vpop.eup %3290  ;;  %v1876_v50 = vmul.f32 1.442695, %v1865_v48 }
 0x348   :  { %3152 = vmatmul.mubr.msk.f32.vlgmr.msra.gmra.mrb[4].mxu0 %vm1837_vm3, %v3291_v49  ;;  %v1852_v51 = vpop.xlane.xlu1 %1851  ;;  %v1886_v54 = vsel %vm1837_vm3, %v3291_v49, 0.0 }
 0x349   :  { %3296 = vpow2.f32 %v1876_v50  ;;  %3160 = vmatpush3.msra.mxu0 %v1158_v9  ;;  %v1866_v52 = vsub.f32 %v1605_v22, %v1852_v51  ;;  %1887 = vadd.xlane.f32.xlu0 %v1886_v54 }
 0x34a   :  { %3161 = vmatprep.mubr.msk.f32.mxu0 %vm3473_vm1, %v3472_v44  ;;  %3169 = vmatprep.subr.mxu0 %v3472_v44 }
 0x34b   :  { %v3293_v53 = vpop.eup %3292  ;;  %v1878_v55 = vmul.f32 1.442695, %v1866_v52 }
 0x34c   :  { %v1855_v57 = vpop.xlane.xlu0 %1854  ;;  %3157 = vmatmul.mubr.msk.f32.vlgmr.msra.gmra.mrb[18].mxu1 %vm1837_vm3, %v3293_v53  ;;  %v1889_v58 = vsel %vm1837_vm3, %v3293_v53, 0.0 }
 0x34d   :  { %3298 = vpow2.f32 %v1878_v55  ;;  %v1867_v59 = vsub.f32 %v1681_v25, %v1855_v57  ;;  %3165 = vmatpush3.msra.mxu1 %v1159_v10  ;;  %1890 = vadd.xlane.f32.xlu1 %v1889_v58 }
 0x34e   :  { %3166 = vmatprep.mubr.msk.f32.mxu1 %vm3473_vm1, %v3472_v44  ;;  %3174 = vmatprep.subr.mxu1 %v3472_v44 }
 0x34f   :  { %v3295_v60 = vpop.eup %3294  ;;  %v1880_v38 = vmul.f32 1.442695, %v1867_v59 }
 0x350   :  { %3162 = vmatmul.mubr.msk.f32.vlgmr.msra.gmra.mrb[6].mxu0 %vm1837_vm3, %v3295_v60  ;;  %v1858_v61 = vpop.xlane.xlu1 %1857  ;;  %v1892_v62 = vsel %vm1837_vm3, %v3295_v60, 0.0 }
 0x351   :  { %3300 = vpow2.f32 %v1880_v38  ;;  %v1868_v63 = vsub.f32 %v1757_v28, %v1858_v61  ;;  %1893 = vadd.xlane.f32.xlu0 %v1892_v62  ;;  %3171 = vmatprep.mubr.msk.f32.mxu0 %vm3473_vm1, %v3472_v44 }
 0x353   :  { %v3297_v0 = vpop.eup %3296  ;;  %v1882_v1 = vmul.f32 1.442695, %v1868_v63 }
 0x354   :  { %v1861_v2 = vpop.xlane.xlu0 %1860  ;;  %3167 = vmatmul.mubr.msk.f32.vlgmr.msra.gmra.mrb[20].mxu1 %vm1837_vm3, %v3297_v0  ;;  %v947_v3 = vpop.permute.xlu1 %946  ;;  %v1895_v5 = vsel %vm1837_vm3, %v3297_v0, 0.0 }
 0x355   :  { %3302 = vpow2.f32 %v1882_v1  ;;  %v1869_v6 = vsub.f32 %v3827_v31, %v1861_v2  ;;  %1896 = vadd.xlane.f32.xlu0 %v1895_v5  ;;  %3176 = vmatprep.mubr.msk.f32.mxu1 %vm3473_vm1, %v3472_v44  ;;  %v1024_v9 = vcombine.low %v3638_v45, %v947_v3  ;;  %v1025_v10 = vcombine.high %v3638_v45, %v947_v3 }
 0x357   :  { %v3299_v7 = vpop.eup %3298  ;;  %v1884_v8 = vmul.f32 1.442695, %v1869_v6  ;;  %v1032_v17 = vrot.slane %v1024_v9, %v3648_v56  ;;  %v1039_v18 = vrot.slane %v1025_v10, %v3648_v56 }
 0x358   :  { %v941_v11 = vpop.permute.xlu0 %940  ;;  %v953_v12 = vpop.permute.xlu1 %952  ;;  %v1898_v13 = vsel %vm1837_vm3, %v3299_v7, 0.0 }
 0x359   :  { %3304 = vpow2.f32 %v1884_v8  ;;  %v1040_v14 = vcombine.low %v941_v11, %v953_v12  ;;  %v1041_v15 = vcombine.high %v941_v11, %v953_v12  ;;  %1899 = vadd.xlane.f32.xlu1 %v1898_v13 }
 0x35b   :  { %v3301_v16 = vpop.eup %3300  ;;  %v1048_v43 = vrot.slane %v1040_v14, %v3648_v56  ;;  %v1055_v19 = vrot.slane %v1041_v15, %v3648_v56 }
 0x35c   :  { %v1901_v20 = vsel %vm1837_vm3, %v3301_v16, 0.0 }
 0x35d   :  { %v1056_v45 = vcombine.low %v1032_v17, %v1048_v43  ;;  %v1057_v21 = vcombine.high %v1032_v17, %v1048_v43  ;;  %v1072_v22 = vcombine.low %v1039_v18, %v1055_v19  ;;  %v1073_v23 = vcombine.high %v1039_v18, %v1055_v19  ;;  %1902 = vadd.xlane.f32.xlu0 %v1901_v20 }
 0x35f   :  { %v3303_v24 = vpop.eup %3302  ;;  %v1064_v25 = vrot.slane %v1056_v45, %v3654_v4  ;;  %v1071_v26 = vrot.slane %v1057_v21, %v3654_v4  ;;  %v1080_v27 = vrot.slane %v1072_v22, %v3654_v4  ;;  %v1087_v28 = vrot.slane %v1073_v23, %v3654_v4 }
 0x360   :  { %v1904_v29 = vsel %vm1837_vm3, %v3303_v24, 0.0 }
 0x361   :  { %v1160_v30 = vcombine.low %v1064_v25, %v1071_v26  ;;  %v2947_v31 = vcombine.high %v1064_v25, %v1071_v26  ;;  %v1176_v32 = vcombine.low %v1080_v27, %v1087_v28  ;;  %v2948_v33 = vcombine.high %v1080_v27, %v1087_v28  ;;  %1905 = vadd.xlane.f32.xlu1 %v1904_v29 }
 0x363   :  { %v3305_v46 = vpop.eup %3304  ;;  %v1167_v34 = vrot.slane %v1160_v30, %v3648_v56  ;;  %v1175_v35 = vrot.slane %v2947_v31, %v3648_v56  ;;  %v1183_v36 = vrot.slane %v1176_v32, %v3648_v56  ;;  %v1191_v37 = vrot.slane %v2948_v33, %v3648_v56  ;;  %v2814_v32 = vld [vmem:[#allocation10] sm:$0xff]  ;;  %v2815_v33 = vld [vmem:[#allocation10 + $0x8] sm:$0xff] }
 0x364   :  { %v1907_v39 = vsel %vm1837_vm3, %v3305_v46, 0.0 }
 0x365   :  { %1908 = vadd.xlane.f32.xlu0 %v1907_v39  ;;  %v1192_v40 = vcombine.low %v1167_v34, %v1175_v35  ;;  %v1208_v41 = vcombine.low %v1183_v36, %v1191_v37  ;;  %v1193_v42 = vcombine.high %v1167_v34, %v1175_v35  ;;  %v1209_v47 = vcombine.high %v1183_v36, %v1191_v37 }
 0x367   :  { %v1200_v48 = vrot.slane %v1192_v40, %v3654_v4  ;;  %v1216_v49 = vrot.slane %v1208_v41, %v3654_v4  ;;  %v1207_v50 = vrot.slane %v1193_v42, %v3654_v4  ;;  %v1223_v51 = vrot.slane %v1209_v47, %v3654_v4  ;;  %v2817_v40 = vld [vmem:[#allocation10 + $0x18] sm:$0xff] }
 0x368   :  { %v3256_v41 = vpack.c.bf16 %v2815_v33, %v2814_v32 }
 0x369   :  { %v1224_v54 = vcombine.low %v1200_v48, %v1216_v49  ;;  %v1225_v52 = vcombine.high %v1200_v48, %v1216_v49  ;;  %v1226_v53 = vcombine.low %v1207_v50, %v1223_v51  ;;  %v1227_v55 = vcombine.high %v1207_v50, %v1223_v51 }
 0x36b   :  { %3170 = vmatpush3.msra.mxu0 %v1224_v54  ;;  %3175 = vmatpush3.msra.mxu1 %v1225_v52  ;;  %v2818_v54 = vld [vmem:[#allocation10 + $0x20] sm:$0xff]  ;;  %v2819_v52 = vld [vmem:[#allocation10 + $0x28] sm:$0xff] }
 0x36c   :  { %3172 = vmatmul.mubr.msk.f32.vlgmr.msra.gmra.mrb[8].mxu0 %vm1837_vm3, %v3299_v7  ;;  %3177 = vmatmul.mubr.msk.f32.vlgmr.msra.gmra.mrb[22].mxu1 %vm1837_vm3, %v3301_v16 }
 0x36d   :  { %3179 = vmatprep.subr.mxu0 %v3472_v44  ;;  %3184 = vmatprep.subr.mxu1 %v3472_v44 }
 0x36e   :  { %3180 = vmatpush3.msra.mxu0 %v1226_v53  ;;  %3185 = vmatpush3.msra.mxu1 %v1227_v55 }
 0x36f   :  { %3181 = vmatprep.mubr.msk.f32.mxu0 %vm3473_vm1, %v3472_v44  ;;  %3186 = vmatprep.mubr.msk.f32.mxu1 %vm3473_vm1, %v3472_v44 }
 0x370   :  { %3182 = vmatmul.mubr.msk.f32.vlgmr.msra.gmra.mrb[10].mxu0 %vm1837_vm3, %v3303_v24  ;;  %3187 = vmatmul.mubr.msk.f32.vlgmr.msra.gmra.mrb[24].mxu1 %vm1837_vm3, %v3305_v46  ;;  %v2816_v46 = vld [vmem:[#allocation10 + $0x10] sm:$0xff] }
 0x371   :  { %v3260_v42 = vpack.c.bf16 %v2817_v40, %v2816_v46  ;;  %3257 = vmatprep.subr.bf16.mxu0 %v3256_v41 }
 0x372   :  { %3259 = vmatpush3.bf16.msra.mxu0 %v3256_v41 }
 0x373   :  { %3261 = vmatprep.subr.bf16.mxu0 %v3260_v42 }
 0x376   :  { %3263 = vmatpush3.bf16.msra.mxu0 %v3260_v42 }
 0x3d6   :  { %v1888_v57 = vpop.xlane.xlu0 %1887 }
 0x3d7   :  { %3306 = vrcp.f32 %v1888_v57 }
 0x3da   :  { %v1891_v59 = vpop.xlane.xlu1 %1890 }
 0x3de   :  { %v1894_v58 = vpop.xlane.xlu0 %1893 }
 0x3df   :  { %3308 = vrcp.f32 %v1894_v58 }
 0x3e0   :  { %3310 = vrcp.f32 %v1891_v59  ;;  %v3264_v59 = vpack.c.bf16 %v2819_v52, %v2818_v54 }
 0x3e1   :  { %v3307_v0 = vpop.eup %3306 }
 0x3e2   :  { %v1897_v60 = vpop.xlane.xlu0 %1896  ;;  %3265 = vmatprep.subr.bf16.mxu0 %v3264_v59 }
 0x3e3   :  { %3312 = vrcp.f32 %v1897_v60  ;;  %3267 = vmatpush3.bf16.msra.mxu0 %v3264_v59 }
 0x3e6   :  { %v1900_v22 = vpop.xlane.xlu1 %1899 }
 0x3e7   :  { %3314 = vrcp.f32 %v1900_v22 }
 0x3e9   :  { %v3309_v1 = vpop.eup %3308 }
 0x3ea   :  { %v3311_v6 = vpop.eup %3310  ;;  %v1903_v27 = vpop.xlane.xlu0 %1902 }
 0x3eb   :  { %3316 = vrcp.f32 %v1903_v27 }
 0x3ed   :  { %v3313_v9 = vpop.eup %3312 }
 0x3ee   :  { %v1906_v34 = vpop.xlane.xlu1 %1905 }
 0x3ef   :  { %3318 = vrcp.f32 %v1906_v34 }
 0x3f2   :  { %v1909_v47 = vpop.xlane.xlu0 %1908 }
 0x3f3   :  { %3320 = vrcp.f32 %v1909_v47 }
 0x41b   :  { %v1979_v38 = vpop.f32.mrb[4].mxu0 }
 0x41c   :  { %v3153_v61 = vpop.f32.mrb[5].mxu0  ;;  %v2502_v44 = vmul.f32 %v3307_v0, %v1979_v38 }
 0x41f   :  { %v2052_v62 = vpop.f32.mrb[18].mxu1 }
 0x420   :  { %v3158_v63 = vpop.f32.mrb[19].mxu1  ;;  %v2503_v11 = vmul.f32 %v3311_v6, %v2052_v62 }
 0x421   :  { %v3315_v63 = vpop.eup %3314 }
 0x422   :  { %v3317_v0 = vpop.eup %3316 }
 0x423   :  { %v2125_v2 = vpop.f32.mrb[6].mxu0 }
 0x424   :  { %v2504_v3 = vmul.f32 %v3309_v1, %v2125_v2  ;;  %v3163_v5 = vpop.f32.mrb[7].mxu0 }
 0x425   :  { %v3319_v5 = vpop.eup %3318 }
 0x426   :  { %v2510_v7 = vcombine.low %v2502_v44, %v2504_v3  ;;  %v2511_v8 = vcombine.high %v2502_v44, %v2504_v3  ;;  %v3321_v6 = vpop.eup %3320 }
 0x427   :  { %v2198_v10 = vpop.f32.mrb[20].mxu1 }
 0x428   :  { %v2505_v12 = vmul.f32 %v3313_v9, %v2198_v10  ;;  %v3168_v13 = vpop.f32.mrb[21].mxu1  ;;  %v2518_v16 = vrot.slane %v2510_v7, %v3648_v56  ;;  %v2525_v17 = vrot.slane %v2511_v8, %v3648_v56 }
 0x42a   :  { %v2526_v14 = vcombine.low %v2503_v11, %v2505_v12  ;;  %v2527_v15 = vcombine.high %v2503_v11, %v2505_v12 }
 0x42c   :  { %v2534_v18 = vrot.slane %v2526_v14, %v3648_v56  ;;  %v2541_v43 = vrot.slane %v2527_v15, %v3648_v56 }
 0x42e   :  { %v2542_v19 = vcombine.low %v2518_v16, %v2534_v18  ;;  %v2543_v20 = vcombine.high %v2518_v16, %v2534_v18  ;;  %v2558_v45 = vcombine.low %v2525_v17, %v2541_v43  ;;  %v2559_v21 = vcombine.high %v2525_v17, %v2541_v43 }
 0x430   :  { %v2550_v23 = vrot.slane %v2542_v19, %v3654_v4  ;;  %v2557_v24 = vrot.slane %v2543_v20, %v3654_v4  ;;  %v2566_v25 = vrot.slane %v2558_v45, %v3654_v4  ;;  %v2573_v26 = vrot.slane %v2559_v21, %v3654_v4 }
 0x432   :  { %v2646_v28 = vcombine.low %v2550_v23, %v2557_v24  ;;  %v2973_v29 = vcombine.high %v2550_v23, %v2557_v24  ;;  %v2662_v30 = vcombine.low %v2566_v25, %v2573_v26  ;;  %v2974_v31 = vcombine.high %v2566_v25, %v2573_v26 }
 0x434   :  { %v2653_v35 = vrot.slane %v2646_v28, %v3648_v56  ;;  %v2661_v36 = vrot.slane %v2973_v29, %v3648_v56  ;;  %v2669_v37 = vrot.slane %v2662_v30, %v3648_v56  ;;  %v2677_v39 = vrot.slane %v2974_v31, %v3648_v56  ;;  %v2820_v29 = vld [vmem:[#allocation10 + $0x30] sm:$0xff]  ;;  %v2821_v30 = vld [vmem:[#allocation10 + $0x38] sm:$0xff] }
 0x435   :  { %v3268_v31 = vpack.c.bf16 %v2821_v30, %v2820_v29 }
 0x436   :  { %v2678_v48 = vcombine.low %v2653_v35, %v2661_v36  ;;  %v2694_v49 = vcombine.low %v2669_v37, %v2677_v39  ;;  %v2679_v50 = vcombine.high %v2653_v35, %v2661_v36  ;;  %v2695_v51 = vcombine.high %v2669_v37, %v2677_v39 }
 0x437   :  { %3269 = vmatprep.subr.bf16.mxu0 %v3268_v31 }
 0x438   :  { %v3904_v53 = vrot.slane %v2678_v48, %v3654_v4  ;;  %v3907_v55 = vrot.slane %v2694_v49, %v3654_v4  ;;  %v3910_v57 = vrot.slane %v2679_v50, %v3654_v4  ;;  %v3913_v58 = vrot.slane %v2695_v51, %v3654_v4  ;;  %3271 = vmatpush3.bf16.msra.mxu0 %v3268_v31 }
 0x43a   :  { %v2711_v60 = vcombine.high %v3904_v53, %v3907_v55  ;;  %v2712_v38 = vcombine.low %v3910_v57, %v3913_v58  ;;  %v2713_v61 = vcombine.high %v3910_v57, %v3913_v58  ;;  %v2710_v62 = vcombine.low %v3904_v53, %v3907_v55  ;;  %v2977_v58 = vld [vmem:[%s3978_s5] ss:$0 sm:$0xff] }
 0x43c   :  { %2784 = vrot.lane.b32.xlu1 %v2711_v60, %s3476_s24 }
 0x43f   :  { %v2271_v1 = vpop.f32.mrb[8].mxu0  ;;  %v2344_v2 = vpop.f32.mrb[22].mxu1 }
 0x440   :  { %v3173_v44 = vpop.f32.mrb[9].mxu0  ;;  %v3178_v3 = vpop.f32.mrb[23].mxu1  ;;  %2792 = vrot.lane.b32.xlu1 %v2712_v38, %s3477_s12  ;;  %v2506_v9 = vmul.f32 %v3315_v63, %v2271_v1  ;;  %v2507_v10 = vmul.f32 %v3317_v0, %v2344_v2 }
 0x443   :  { %v2417_v7 = vpop.f32.mrb[10].mxu0  ;;  %v2490_v8 = vpop.f32.mrb[24].mxu1 }
 0x444   :  { %v2508_v11 = vmul.f32 %v3319_v5, %v2417_v7  ;;  %v2509_v12 = vmul.f32 %v3321_v6, %v2490_v8  ;;  %v3183_v13 = vpop.f32.mrb[11].mxu0  ;;  %v3188_v14 = vpop.f32.mrb[25].mxu1 }
 0x446   :  { %v2578_v15 = vcombine.low %v2506_v9, %v2508_v11  ;;  %v2579_v16 = vcombine.high %v2506_v9, %v2508_v11  ;;  %v2594_v17 = vcombine.low %v2507_v10, %v2509_v12  ;;  %v2595_v18 = vcombine.high %v2507_v10, %v2509_v12 }
 0x448   :  { %v2586_v43 = vrot.slane %v2578_v15, %v3648_v56  ;;  %v2593_v19 = vrot.slane %v2579_v16, %v3648_v56  ;;  %v2602_v20 = vrot.slane %v2594_v17, %v3648_v56  ;;  %v2609_v45 = vrot.slane %v2595_v18, %v3648_v56 }
 0x44a   :  { %v2610_v21 = vcombine.low %v2586_v43, %v2602_v20  ;;  %v2611_v22 = vcombine.high %v2586_v43, %v2602_v20  ;;  %v2626_v23 = vcombine.low %v2593_v19, %v2609_v45  ;;  %v2627_v24 = vcombine.high %v2593_v19, %v2609_v45 }
 0x44c   :  { %v2618_v25 = vrot.slane %v2610_v21, %v3654_v4  ;;  %v2625_v26 = vrot.slane %v2611_v22, %v3654_v4  ;;  %v2634_v27 = vrot.slane %v2626_v23, %v3654_v4  ;;  %v2641_v28 = vrot.slane %v2627_v24, %v3654_v4 }
 0x44e   :  { %v2714_v32 = vcombine.low %v2618_v25, %v2625_v26  ;;  %v2975_v33 = vcombine.high %v2618_v25, %v2625_v26  ;;  %v2730_v46 = vcombine.low %v2634_v27, %v2641_v28  ;;  %v2976_v34 = vcombine.high %v2634_v27, %v2641_v28 }
 0x450   :  { %v2721_v35 = vrot.slane %v2714_v32, %v3648_v56  ;;  %v2729_v36 = vrot.slane %v2975_v33, %v3648_v56  ;;  %v2737_v37 = vrot.slane %v2730_v46, %v3648_v56  ;;  %v2745_v39 = vrot.slane %v2976_v34, %v3648_v56 }
 0x452   :  { %v2747_v40 = vcombine.high %v2721_v35, %v2729_v36  ;;  %v2763_v41 = vcombine.high %v2737_v37, %v2745_v39  ;;  %v2746_v42 = vcombine.low %v2721_v35, %v2729_v36  ;;  %v2762_v47 = vcombine.low %v2737_v37, %v2745_v39 }
 0x454   :  { %v2761_v48 = vrot.slane %v2747_v40, %v3654_v4  ;;  %v2777_v49 = vrot.slane %v2763_v41, %v3654_v4  ;;  %v2754_v50 = vrot.slane %v2746_v42, %v3654_v4  ;;  %v2770_v51 = vrot.slane %v2762_v47, %v3654_v4 }
 0x456   :  { %v2780_v54 = vcombine.low %v2761_v48, %v2777_v49  ;;  %v2779_v52 = vcombine.high %v2754_v50, %v2770_v51  ;;  %v2781_v59 = vcombine.high %v2761_v48, %v2777_v49  ;;  %v2778_v60 = vcombine.low %v2754_v50, %v2770_v51 }
 0x458   :  { %2794 = vrot.lane.b32.xlu1 %v2780_v54, %s3477_s12  ;;  %2786 = vrot.lane.b32.xlu0 %v2779_v52, %s3476_s24 }
 0x45c   :  { %2802 = vrot.lane.b32.xlu1 %v2781_v59, %s3478_s13  ;;  %2800 = vrot.lane.b32.xlu0 %v2713_v61, %s3478_s13 }
 0x4ae   :  { %v2785_v56 = vpop.permute.xlu1 %2784 }
 0x4af   :  { %v2806_v1 = vsel %vm1228_vm2, %v2710_v62, %v2785_v56 }
 0x4b2   :  { %v2793_v38 = vpop.permute.xlu1 %2792 }
 0x4b3   :  { %v2809_v2 = vsel %vm2808_vm4, %v2806_v1, %v2793_v38 }
 0x4ca   :  { %v2787_v63 = vpop.permute.xlu0 %2786  ;;  %v2795_v0 = vpop.permute.xlu1 %2794 }
 0x4cb   :  { %v2807_v4 = vsel %vm1228_vm2, %v2778_v60, %v2787_v63 }
 0x4cc   :  { %v2810_v44 = vsel %vm2808_vm4, %v2807_v4, %v2795_v0 }
 0x4ce   :  { %v2801_v3 = vpop.permute.xlu0 %2800  ;;  %v2803_v5 = vpop.permute.xlu1 %2802 }
 0x4cf   :  { %v2812_v6 = vsel %vm2811_vm5, %v2809_v2, %v2801_v3  ;;  %v2813_v57 = vsel %vm2811_vm5, %v2810_v44, %v2803_v5 }
 0x4d0   :  { %3205 = vmatprep.mubr.msk.f32.mxu0 %vm102_vm0, %v2812_v6 }
 0x4d1   :  { %3206 = vmatmul.mubr.msk.f32.vlgmr.msra.gmra.mrb[12].mxu0 %vm102_vm0, %v2813_v57 }
 0x5a4   :  { %v3207_v61 = vpop.f32.mrb[12].mxu0 }
 0x5a5   :  { %v2907_v53 = vadd.f32 %v3207_v61, %v2977_v58  ;;  %v2901_v55 = vpop.f32.mrb[13].mxu0 }
 0x5a6   :  { %v2902_v62 = vadd.f32 %v2977_v58, %v2901_v55 }
 0x5a7   :  { %2911 = vst.msk [vmem:[#allocation11 + $0x8] sm:$0xff] %vm102_vm0, %v2907_v53 }
 0x5a8   :  { %2910 = vst.msk [vmem:[#allocation11] sm:$0xff] %vm102_vm0, %v2902_v62 }
 0x5a9   :  { %3443 = shalt.err (!%p3440_p2)
}
 0x5aa   :  { %s3444_s20 = scalar_lea.hbm %s3979_s6, 256 }
 0x5ab   :  { %p3445_p3 = scmp.ne.s32.totalorder %s3979_s6, %s3444_s20  ;;  %p3448_p4 = scmp.lt.u32.totalorder %s3444_s20, %s3979_s6 }
 0x5ad   :  { %p3450_p5 = pnand %p3448_p4, %p3445_p3 }
 0x5af   :  { %3453 = shalt.err (!%p3450_p5)
}
 0x5b0   :  { %2923 = dma.vmem_to_hbm [thread:$0]  %s2918_s17, 256, %s3979_s6, [#allocation4], %s3464_s9, %s3464_s9, %s3465_s10  }
 0x5b1   :  { %3460 = dma.done.wait [#allocation4], 256  }
 0x5b2   :  { %3461 = vsyncadd [#allocation4], 4294967040 }
 0x5b3   :  { %2927 = vsyncpa [#allocation3], 1 }
 0x5b4   :  { %2928 = vsyncpa [#allocation6], 1 }
 0x5b5   :  { %2929 = vsyncpa [#allocation9], 1 }
 0x5b6   :  { %2930 = vsyncpa [#allocation4], 1 }

</bundles_post_ra>
